<compile_context>
chip_gen: v6e
topology: v6e:2x2x1
jax: 0.10.0
libtpu: 0.0.40
codegen_flags: <defaults>
</compile_context>

<pallas_src>
import jax
import jax.numpy as jnp
from jax import lax
from jax.experimental import pallas as pl
from jax.experimental.pallas import tpu as pltpu

_OUT_LANES = 128  # lane-dense output width (col 0 = q1, col 1 = q2, rest zero)


# ----------------------------------------------------------------------------
# Kernel (trace-time constants bound via closure)
# ----------------------------------------------------------------------------
def _make_critic_kernel(*, HW, THW, LANE, n_groups, needs_mask):
    def critic_kernel(
        obs_ref, ga_ref,                     # streamed obs, per-batch [action, goal]
        wc_ref, bc_ref,                      # conv head Linear(128, 50)
        w1o_ref, w1ag_ref, b1_ref,           # fused Q layer 1 (split by input block)
        w2_ref, b2_ref,                      # fused Q layer 2 (block-diagonal)
        w3_ref, b3_ref,                      # fused Q layer 3 (lane-padded to 128)
        q_ref,                               # output (TB, 128): col 0=q1, col 1=q2
        pooled_acc,                          # VMEM scratch (TB, C, LANE) running max
    ):
        j = pl.program_id(1)

        @pl.when(j == 0)
        def _():
            pooled_acc[...] = jnp.full(pooled_acc.shape, -jnp.inf, pooled_acc.dtype)

        x = obs_ref[...]                                     # (TB, C, THW)
        if needs_mask:
            # Tail spatial tile: mask padding columns to -inf before the max.
            col = lax.broadcasted_iota(jnp.int32, x.shape, 2)
            x = jnp.where(col + j * THW < HW, x, -jnp.inf)

        # Two-stage AdaptiveMaxPool2d(1): per-step elementwise VPU maxes over
        # 128-lane groups; the cross-lane (XLU) reduce happens once at the end.
        acc = pooled_acc[...]
        for g in range(n_groups):
            acc = jnp.maximum(acc, x[:, :, g * LANE:(g + 1) * LANE])
        pooled_acc[...] = acc

        @pl.when(j == pl.num_programs(1) - 1)
        def _():
            pooled = jnp.max(pooled_acc[...], axis=-1)       # (TB, C), single XLU reduce
            # conv head: Linear(128, 50) + Tanh
            feat = jnp.tanh(
                jnp.dot(pooled, wc_ref[...], preferred_element_type=jnp.float32)
                + bc_ref[...])
            # cat([feat, action, goal], dim=1) @ W1 == two row-block matmuls.
            h = (jnp.dot(feat, w1o_ref[...], preferred_element_type=jnp.float32)
                 + jnp.dot(ga_ref[...], w1ag_ref[...], preferred_element_type=jnp.float32)
                 + b1_ref[...])
            h = jnp.maximum(h, 0.0)                                           # ReLU
            h = jnp.maximum(
                jnp.dot(h, w2_ref[...], preferred_element_type=jnp.float32) + b2_ref[...],
                0.0)                                                          # ReLU
            q_ref[...] = (jnp.dot(h, w3_ref[...], preferred_element_type=jnp.float32)
                          + b3_ref[...])

    return critic_kernel


# ----------------------------------------------------------------------------
# Parameter fusion (trace-time, tiny arrays): pack Q1/Q2 into one head.
# ----------------------------------------------------------------------------
def _fuse_q_heads(q1, q2):
    w1o1, w1a1, w1g1, b11, w21, b21, w31, b31 = q1
    w1o2, w1a2, w1g2, b12, w22, b22, w32, b32 = q2

    # Layer 1: concatenate heads along the output dim -> (in, 2h).
    w1o = jnp.concatenate([w1o1, w1o2], axis=1)                       # obs-feature rows
    w1ag = jnp.concatenate([
        jnp.concatenate([w1a1, w1a2], axis=1),                        # action rows
        jnp.concatenate([w1g1, w1g2], axis=1),                        # goal rows
    ], axis=0)                                                        # (act+goal, 2h)
    b1 = jnp.concatenate([b11, b12], axis=1)

    # Layer 2: block-diagonal (2h, 2h) keeps the two heads independent.
    # (Fine while hidden_dim is tiny; split into two matmuls if h grows large.)
    z2 = jnp.zeros_like(w21)
    w2 = jnp.concatenate([jnp.concatenate([w21, z2], axis=1),
                          jnp.concatenate([z2, w22], axis=1)], axis=0)
    b2 = jnp.concatenate([b21, b22], axis=1)

    # Layer 3: block-diagonal (2h, 2), then lane-pad to 128 output columns so
    # the kernel's final store is unmasked (col 0 = q1, col 1 = q2).
    z3 = jnp.zeros_like(w31)
    w3 = jnp.concatenate([jnp.concatenate([w31, z3], axis=1),
                          jnp.concatenate([z3, w32], axis=1)], axis=0)
    b3 = jnp.concatenate([b31, b32], axis=1)
    w3 = jnp.pad(w3, ((0, 0), (0, _OUT_LANES - w3.shape[1])))
    b3 = jnp.pad(b3, ((0, 0), (0, _OUT_LANES - b3.shape[1])))

    h2 = w2.shape[0]                                                  # = 2 * hidden_dim
    return w1o, w1ag, b1, w2, b2, w3, b3, h2


# ----------------------------------------------------------------------------
# Device / tiling policy
# ----------------------------------------------------------------------------
def _device_vmem_bytes():
    try:
        return int(pltpu.get_tpu_info().vmem_capacity_bytes)
    except Exception:
        return 64 << 20   # conservative default (v7x per-core VMEM)


def _obs_tiling(B, C, HW, vmem_cap):
    """Pick (TB, THW) for streaming obs within this device's VMEM budget."""
    # Batch tile: full B when small; otherwise at least 2 batch grid steps so the
    # "parallel" axis can span both v7x TensorCores (no-op on single-TC v5e/v6e).
    if B <= 8:
        TB = B
    else:
        TB = min(128, ((B + 1) // 2 + 7) // 8 * 8)

    if HW < 128:
        return TB, HW                        # full spatial extent, single step

    # Spatial tile: multiple of 128, sized so double-buffered obs stays within
    # ~60% of device VMEM (~38 MiB on v7x, ~77 MiB on v5e/v6e), capped by HW.
    db_budget = int(0.6 * vmem_cap)
    per_col = 2 * TB * C * 4                 # 2 pipeline buffers, f32 bytes / column
    cols = max(128, (db_budget // per_col) // 128 * 128)
    THW = min(cols, (HW // 128) * 128, 16384)
    return TB, max(THW, 128)


# ----------------------------------------------------------------------------
# Wrapper
# ----------------------------------------------------------------------------
@jax.jit
def critic_forward(obs_nchw, goal, action, params):
    """obs_nchw: (B, 128, H, W); goal: (B, goal_dim); action: (B, 3)."""
    B, C, H, W = obs_nchw.shape
    HW = H * W
    obs = obs_nchw.reshape(B, C, HW)                 # free reshape (contiguous)
    # Note: if the real obs tensor is uint8/bf16 upstream, stream it in that
    # dtype instead (this kernel is HBM-bound on obs bytes).
    ga = jnp.concatenate([action, goal], axis=1)     # order matches cat([obs, action, goal])
    ga_dim = ga.shape[1]
    enc_dim = params["wc"].shape[1]

    w1o, w1ag, b1, w2, b2, w3, b3, h2 = _fuse_q_heads(params["q1"], params["q2"])

    # --- tiling ---------------------------------------------------------------
    vmem_cap = _device_vmem_bytes()
    TB, THW = _obs_tiling(B, C, HW, vmem_cap)
    LANE = THW if THW < 128 else 128
    n_groups = THW // LANE
    needs_mask = (HW % THW) != 0
    grid = (pl.cdiv(B, TB), pl.cdiv(HW, THW))

    batch_map = lambda i, j: (i, 0)
    const_map = lambda i, j: (0, 0)

    in_specs = [
        pl.BlockSpec((TB, C, THW), lambda i, j: (i, 0, j)),     # obs (streamed)
        pl.BlockSpec((TB, ga_dim), batch_map),                  # [action, goal]
        pl.BlockSpec((C, enc_dim), const_map),                  # wc   (resident)
        pl.BlockSpec((1, enc_dim), const_map),                  # bc
        pl.BlockSpec((enc_dim, h2), const_map),                 # w1_obs
        pl.BlockSpec((ga_dim, h2), const_map),                  # w1_[action,goal]
        pl.BlockSpec((1, h2), const_map),                       # b1
        pl.BlockSpec((h2, h2), const_map),                      # w2 (block-diag)
        pl.BlockSpec((1, h2), const_map),                       # b2
        pl.BlockSpec((h2, _OUT_LANES), const_map),              # w3 (lane-padded)
        pl.BlockSpec((1, _OUT_LANES), const_map),               # b3
    ]
    out_spec = pl.BlockSpec((TB, _OUT_LANES), batch_map)

    # HBM traffic is dominated by obs; tell XLA so.
    param_bytes = 4 * (C * enc_dim + enc_dim + (enc_dim + ga_dim) * h2 + h2
                       + h2 * h2 + h2 + h2 * _OUT_LANES + _OUT_LANES)
    cost = pl.CostEstimate(
        flops=int(B * C * HW                                     # max-pool compares
                  + 2 * B * (C * enc_dim + (enc_dim + ga_dim) * h2
                             + h2 * h2 + h2 * _OUT_LANES)),
        transcendentals=int(B * enc_dim),                        # tanh
        bytes_accessed=int(4 * (B * C * HW + B * (ga_dim + _OUT_LANES)) + param_bytes),
    )

    # VMEM budget: double-buffered obs + slack, clamped below physical VMEM.
    need = 2 * TB * C * THW * 4 + (4 << 20)
    vmem_limit = int(min(max(need, 16 << 20), int(0.75 * vmem_cap)))

    kernel = _make_critic_kernel(HW=HW, THW=THW, LANE=LANE,
                                 n_groups=n_groups, needs_mask=needs_mask)

    q = pl.pallas_call(
        kernel,
        out_shape=jax.ShapeDtypeStruct((B, _OUT_LANES), jnp.float32),
        grid_spec=pltpu.PrefetchScalarGridSpec(
            num_scalar_prefetch=0,
            grid=grid,
            in_specs=in_specs,
            out_specs=out_spec,
            scratch_shapes=[pltpu.VMEM((TB, C, LANE), jnp.float32)],
        ),
        compiler_params=pltpu.CompilerParams(
            dimension_semantics=("parallel", "arbitrary"),
            vmem_limit_bytes=vmem_limit,
        ),
        cost_estimate=cost,
    )(obs, ga, params["wc"], params["bc"], w1o, w1ag, b1, w2, b2, w3, b3)

    return q[:, 0:1], q[:, 1:2]


# ----------------------------------------------------------------------------
# Synthetic params + pure-JAX reference
# ----------------------------------------------------------------------------
def init_params(key, goal_dim, hidden_dim, encoder_feature_dim=50, conv_in=128,
                action_dim=3):
    """Deterministic synthetic init (not a checkpoint load)."""
    ks = jax.random.split(key, 4)
    s = 0.1

    def qfn_params(kq):
        kk = jax.random.split(kq, 8)
        return (
            s * jax.random.normal(kk[0], (encoder_feature_dim, hidden_dim), jnp.float32),  # w1_obs
            s * jax.random.normal(kk[1], (action_dim, hidden_dim), jnp.float32),           # w1_act
            s * jax.random.normal(kk[2], (goal_dim, hidden_dim), jnp.float32),             # w1_goal
            s * jax.random.normal(kk[3], (1, hidden_dim), jnp.float32),                    # b1
            s * jax.random.normal(kk[4], (hidden_dim, hidden_dim), jnp.float32),           # w2
            s * jax.random.normal(kk[5], (1, hidden_dim), jnp.float32),                    # b2
            s * jax.random.normal(kk[6], (hidden_dim, 1), jnp.float32),                    # w3
            s * jax.random.normal(kk[7], (1, 1), jnp.float32),                             # b3
        )

    return {
        "wc": s * jax.random.normal(ks[0], (conv_in, encoder_feature_dim), jnp.float32),
        "bc": s * jax.random.normal(ks[1], (1, encoder_feature_dim), jnp.float32),
        "q1": qfn_params(ks[2]),
        "q2": qfn_params(ks[3]),
    }


def critic_forward_ref(obs_nchw, goal, action, params):
    """Pure-JAX reference mirroring the PyTorch forward exactly."""
    B, C, H, W = obs_nchw.shape
    pooled = jnp.max(obs_nchw.reshape(B, C, H * W), axis=-1)   # AdaptiveMaxPool2d(1)+Flatten
    feat = jnp.tanh(pooled @ params["wc"] + params["bc"])      # Linear(128,50)+Tanh

    def qfn(p):
        w1o, w1a, w1g, b1, w2, b2, w3, b3 = p
        w1 = jnp.concatenate([w1o, w1a, w1g], axis=0)          # rows: [obs, action, goal]
        x = jnp.concatenate([feat, action, goal], axis=1)      # cat([obs, action, goal], dim=1)
        h = jax.nn.relu(x @ w1 + b1)
        h = jax.nn.relu(h @ w2 + b2)
        return h @ w3 + b3

    return qfn(params["q1"]), qfn(params["q2"])


if __name__ == "__main__":
    B, C, H, W = 2, 128, 16, 16        # C=128 forced by nn.Linear(128, 50) in self.conv
    goal_dim, action_dim, hidden_dim = 5, 3, 32

    key = jax.random.PRNGKey(0)
    k_obs, k_goal, k_act, k_par = jax.random.split(key, 4)

    obs = jax.random.normal(k_obs, (B, C, H, W), jnp.float32)
    goal = jax.random.normal(k_goal, (B, goal_dim), jnp.float32)
    action = jax.random.normal(k_act, (B, action_dim), jnp.float32)  # act_tok = None (identity)
    params = init_params(k_par, goal_dim, hidden_dim)

    q1, q2 = critic_forward(obs, goal, action, params)
    q1 = jax.block_until_ready(q1)
    q2 = jax.block_until_ready(q2)

    q1_ref, q2_ref = critic_forward_ref(obs, goal, action, params)
    assert q1.shape == (B, 1) and q2.shape == (B, 1)
    assert jnp.allclose(q1, q1_ref, atol=1e-5, rtol=1e-5)
    assert jnp.allclose(q2, q2_ref, atol=1e-5, rtol=1e-5)

    print("KERNEL_OK")
</pallas_src>

<mosaic_0001>
module attributes {stable_mosaic.version = 11 : i64} {
  func.func @critic_kernel(%arg0: i32, %arg1: i32, %arg2: memref<2x128x256xf32, #tpu.memory_space<vmem>>, %arg3: memref<2x8xf32, #tpu.memory_space<vmem>>, %arg4: memref<128x50xf32, #tpu.memory_space<vmem>>, %arg5: memref<1x50xf32, #tpu.memory_space<vmem>>, %arg6: memref<50x64xf32, #tpu.memory_space<vmem>>, %arg7: memref<8x64xf32, #tpu.memory_space<vmem>>, %arg8: memref<1x64xf32, #tpu.memory_space<vmem>>, %arg9: memref<64x64xf32, #tpu.memory_space<vmem>>, %arg10: memref<1x64xf32, #tpu.memory_space<vmem>>, %arg11: memref<64x128xf32, #tpu.memory_space<vmem>>, %arg12: memref<1x128xf32, #tpu.memory_space<vmem>>, %arg13: memref<2x128xf32, #tpu.memory_space<vmem>>, %arg14: memref<2x128x128xf32, #tpu.memory_space<vmem>>) attributes {dimension_semantics = [#tpu.dimension_semantics<parallel>, #tpu.dimension_semantics<arbitrary>], iteration_bounds = array<i64: 1, 1>, scalar_prefetch = 0 : i64, scratch_operands = 1 : i64, tpu.core_type = #tpu.core_type<tc>, window_params = [{transform_indices = @transform_0, window_bounds = array<i64: 2, 128, 256>}, {transform_indices = @transform_1, window_bounds = array<i64: 2, 8>}, {pipeline_mode = #tpu.pipeline_mode<synchronous>, transform_indices = @transform_2, window_bounds = array<i64: 128, 50>}, {pipeline_mode = #tpu.pipeline_mode<synchronous>, transform_indices = @transform_3, window_bounds = array<i64: 1, 50>}, {pipeline_mode = #tpu.pipeline_mode<synchronous>, transform_indices = @transform_4, window_bounds = array<i64: 50, 64>}, {pipeline_mode = #tpu.pipeline_mode<synchronous>, transform_indices = @transform_5, window_bounds = array<i64: 8, 64>}, {pipeline_mode = #tpu.pipeline_mode<synchronous>, transform_indices = @transform_6, window_bounds = array<i64: 1, 64>}, {pipeline_mode = #tpu.pipeline_mode<synchronous>, transform_indices = @transform_7, window_bounds = array<i64: 64, 64>}, {pipeline_mode = #tpu.pipeline_mode<synchronous>, transform_indices = @transform_8, window_bounds = array<i64: 1, 64>}, {pipeline_mode = #tpu.pipeline_mode<synchronous>, transform_indices = @transform_9, window_bounds = array<i64: 64, 128>}, {pipeline_mode = #tpu.pipeline_mode<synchronous>, transform_indices = @transform_10, window_bounds = array<i64: 1, 128>}, {transform_indices = @transform_11, window_bounds = array<i64: 2, 128>}]} {
    %c0_i32 = arith.constant 0 : i32
    %0 = arith.cmpi eq, %arg1, %c0_i32 : i32
    %1 = arith.extui %0 : i1 to i32
    %c0_i32_0 = arith.constant 0 : i32
    %2 = arith.cmpi ne, %1, %c0_i32_0 : i32
    scf.if %2 {
      %cst = arith.constant 0xFF800000 : f32
      %13 = vector.broadcast %cst : f32 to vector<2x128x128xf32>
      %c0_11 = arith.constant 0 : index
      %c0_12 = arith.constant 0 : index
      %c0_13 = arith.constant 0 : index
      %14 = vector.load %arg14[%c0_11, %c0_12, %c0_13] : memref<2x128x128xf32, #tpu.memory_space<vmem>>, vector<2x128x128xf32>
      tpu.vector_store %arg14[%c0_11, %c0_12, %c0_13], %13 {strides = array<i32>} : memref<2x128x128xf32, #tpu.memory_space<vmem>>, vector<2x128x128xf32>,
    } else {
    }
    %c0 = arith.constant 0 : index
    %c0_1 = arith.constant 0 : index
    %c0_2 = arith.constant 0 : index
    %3 = vector.load %arg2[%c0, %c0_1, %c0_2] : memref<2x128x256xf32, #tpu.memory_space<vmem>>, vector<2x128x256xf32>
    %c0_3 = arith.constant 0 : index
    %c0_4 = arith.constant 0 : index
    %c0_5 = arith.constant 0 : index
    %4 = vector.load %arg14[%c0_3, %c0_4, %c0_5] : memref<2x128x128xf32, #tpu.memory_space<vmem>>, vector<2x128x128xf32>
    %5 = vector.extract_strided_slice %3 {offsets = [0, 0, 0], sizes = [2, 128, 128], strides = [1, 1, 1]} : vector<2x128x256xf32> to vector<2x128x128xf32>
    %6 = arith.maximumf %4, %5 : vector<2x128x128xf32>
    %7 = vector.extract_strided_slice %3 {offsets = [0, 0, 128], sizes = [2, 128, 128], strides = [1, 1, 1]} : vector<2x128x256xf32> to vector<2x128x128xf32>
    %8 = arith.maximumf %6, %7 : vector<2x128x128xf32>
    %c0_6 = arith.constant 0 : index
    %c0_7 = arith.constant 0 : index
    %c0_8 = arith.constant 0 : index
    %9 = vector.load %arg14[%c0_6, %c0_7, %c0_8] : memref<2x128x128xf32, #tpu.memory_space<vmem>>, vector<2x128x128xf32>
    tpu.vector_store %arg14[%c0_6, %c0_7, %c0_8], %8 {strides = array<i32>} : memref<2x128x128xf32, #tpu.memory_space<vmem>>, vector<2x128x128xf32>,
    %c0_i32_9 = arith.constant 0 : i32
    %10 = arith.cmpi eq, %arg1, %c0_i32_9 : i32
    %11 = arith.extui %10 : i1 to i32
    %c0_i32_10 = arith.constant 0 : i32
    %12 = arith.cmpi ne, %11, %c0_i32_10 : i32
    scf.if %12 {
      %c0_11 = arith.constant 0 : index
      %c0_12 = arith.constant 0 : index
      %c0_13 = arith.constant 0 : index
      %13 = vector.load %arg14[%c0_11, %c0_12, %c0_13] : memref<2x128x128xf32, #tpu.memory_space<vmem>>, vector<2x128x128xf32>
      %cst = arith.constant dense<0xFF800000> : vector<2x128xf32>
      %14 = vector.multi_reduction <maximumf>, %13, %cst [2] : vector<2x128x128xf32> to vector<2x128xf32>
      %c0_14 = arith.constant 0 : index
      %c0_15 = arith.constant 0 : index
      %15 = vector.load %arg4[%c0_14, %c0_15] : memref<128x50xf32, #tpu.memory_space<vmem>>, vector<128x50xf32>
      %cst_16 = arith.constant dense<0.000000e+00> : vector<2x50xf32>
      %16 = tpu.matmul %14, %15, %cst_16 {dimension_numbers = #tpu.dot_dimension_numbers<[1], [0], [0], [1], [0, 0, 1, 1], [], []>} : vector<2x128xf32>, vector<128x50xf32>, vector<2x50xf32> -> vector<2x50xf32>
      %c0_17 = arith.constant 0 : index
      %c0_18 = arith.constant 0 : index
      %17 = vector.load %arg5[%c0_17, %c0_18] : memref<1x50xf32, #tpu.memory_space<vmem>>, vector<1x50xf32>
      %18 = vector.broadcast %17 : vector<1x50xf32> to vector<2x50xf32>
      %19 = arith.addf %16, %18 : vector<2x50xf32>
      %20 = math.tanh %19 : vector<2x50xf32>
      %c0_19 = arith.constant 0 : index
      %c0_20 = arith.constant 0 : index
      %21 = vector.load %arg6[%c0_19, %c0_20] : memref<50x64xf32, #tpu.memory_space<vmem>>, vector<50x64xf32>
      %cst_21 = arith.constant dense<0.000000e+00> : vector<2x64xf32>
      %22 = tpu.matmul %20, %21, %cst_21 {dimension_numbers = #tpu.dot_dimension_numbers<[1], [0], [0], [1], [0, 0, 1, 1], [], []>} : vector<2x50xf32>, vector<50x64xf32>, vector<2x64xf32> -> vector<2x64xf32>
      %c0_22 = arith.constant 0 : index
      %c0_23 = arith.constant 0 : index
      %23 = vector.load %arg3[%c0_22, %c0_23] : memref<2x8xf32, #tpu.memory_space<vmem>>, vector<2x8xf32>
      %c0_24 = arith.constant 0 : index
      %c0_25 = arith.constant 0 : index
      %24 = vector.load %arg7[%c0_24, %c0_25] : memref<8x64xf32, #tpu.memory_space<vmem>>, vector<8x64xf32>
      %cst_26 = arith.constant dense<0.000000e+00> : vector<2x64xf32>
      %25 = tpu.matmul %23, %24, %cst_26 {dimension_numbers = #tpu.dot_dimension_numbers<[1], [0], [0], [1], [0, 0, 1, 1], [], []>} : vector<2x8xf32>, vector<8x64xf32>, vector<2x64xf32> -> vector<2x64xf32>
      %26 = arith.addf %22, %25 : vector<2x64xf32>
      %c0_27 = arith.constant 0 : index
      %c0_28 = arith.constant 0 : index
      %27 = vector.load %arg8[%c0_27, %c0_28] : memref<1x64xf32, #tpu.memory_space<vmem>>, vector<1x64xf32>
      %28 = vector.broadcast %27 : vector<1x64xf32> to vector<2x64xf32>
      %29 = arith.addf %26, %28 : vector<2x64xf32>
      %cst_29 = arith.constant 0.000000e+00 : f32
      %30 = vector.broadcast %cst_29 : f32 to vector<2x64xf32>
      %31 = arith.maximumf %29, %30 : vector<2x64xf32>
      %c0_30 = arith.constant 0 : index
      %c0_31 = arith.constant 0 : index
      %32 = vector.load %arg9[%c0_30, %c0_31] : memref<64x64xf32, #tpu.memory_space<vmem>>, vector<64x64xf32>
      %cst_32 = arith.constant dense<0.000000e+00> : vector<2x64xf32>
      %33 = tpu.matmul %31, %32, %cst_32 {dimension_numbers = #tpu.dot_dimension_numbers<[1], [0], [0], [1], [0, 0, 1, 1], [], []>} : vector<2x64xf32>, vector<64x64xf32>, vector<2x64xf32> -> vector<2x64xf32>
      %c0_33 = arith.constant 0 : index
      %c0_34 = arith.constant 0 : index
      %34 = vector.load %arg10[%c0_33, %c0_34] : memref<1x64xf32, #tpu.memory_space<vmem>>, vector<1x64xf32>
      %35 = vector.broadcast %34 : vector<1x64xf32> to vector<2x64xf32>
      %36 = arith.addf %33, %35 : vector<2x64xf32>
      %cst_35 = arith.constant 0.000000e+00 : f32
      %37 = vector.broadcast %cst_35 : f32 to vector<2x64xf32>
      %38 = arith.maximumf %36, %37 : vector<2x64xf32>
      %c0_36 = arith.constant 0 : index
      %c0_37 = arith.constant 0 : index
      %39 = vector.load %arg11[%c0_36, %c0_37] : memref<64x128xf32, #tpu.memory_space<vmem>>, vector<64x128xf32>
      %cst_38 = arith.constant dense<0.000000e+00> : vector<2x128xf32>
      %40 = tpu.matmul %38, %39, %cst_38 {dimension_numbers = #tpu.dot_dimension_numbers<[1], [0], [0], [1], [0, 0, 1, 1], [], []>} : vector<2x64xf32>, vector<64x128xf32>, vector<2x128xf32> -> vector<2x128xf32>
      %c0_39 = arith.constant 0 : index
      %c0_40 = arith.constant 0 : index
      %41 = vector.load %arg12[%c0_39, %c0_40] : memref<1x128xf32, #tpu.memory_space<vmem>>, vector<1x128xf32>
      %42 = vector.broadcast %41 : vector<1x128xf32> to vector<2x128xf32>
      %43 = arith.addf %40, %42 : vector<2x128xf32>
      %c0_41 = arith.constant 0 : index
      %c0_42 = arith.constant 0 : index
      %44 = vector.load %arg13[%c0_41, %c0_42] : memref<2x128xf32, #tpu.memory_space<vmem>>, vector<2x128xf32>
      tpu.vector_store %arg13[%c0_41, %c0_42], %43 {strides = array<i32>} : memref<2x128xf32, #tpu.memory_space<vmem>>, vector<2x128xf32>,
    } else {
    }
    return
  }
  func.func @transform_0(%arg0: i32, %arg1: i32) -> (i32, i32, i32) {
    %c0_i32 = arith.constant 0 : i32
    %c0_i32_0 = arith.constant 0 : i32
    return %arg0, %c0_i32, %arg1 : i32, i32, i32
  }
  func.func @transform_1(%arg0: i32, %arg1: i32) -> (i32, i32) {
    %c0_i32 = arith.constant 0 : i32
    %c0_i32_0 = arith.constant 0 : i32
    return %arg0, %c0_i32 : i32, i32
  }
  func.func @transform_2(%arg0: i32, %arg1: i32) -> (i32, i32) {
    %c0_i32 = arith.constant 0 : i32
    %c0_i32_0 = arith.constant 0 : i32
    %c0_i32_1 = arith.constant 0 : i32
    return %c0_i32, %c0_i32_0 : i32, i32
  }
  func.func @transform_3(%arg0: i32, %arg1: i32) -> (i32, i32) {
    %c0_i32 = arith.constant 0 : i32
    %c0_i32_0 = arith.constant 0 : i32
    %c0_i32_1 = arith.constant 0 : i32
    return %c0_i32, %c0_i32_0 : i32, i32
  }
  func.func @transform_4(%arg0: i32, %arg1: i32) -> (i32, i32) {
    %c0_i32 = arith.constant 0 : i32
    %c0_i32_0 = arith.constant 0 : i32
    %c0_i32_1 = arith.constant 0 : i32
    return %c0_i32, %c0_i32_0 : i32, i32
  }
  func.func @transform_5(%arg0: i32, %arg1: i32) -> (i32, i32) {
    %c0_i32 = arith.constant 0 : i32
    %c0_i32_0 = arith.constant 0 : i32
    %c0_i32_1 = arith.constant 0 : i32
    return %c0_i32, %c0_i32_0 : i32, i32
  }
  func.func @transform_6(%arg0: i32, %arg1: i32) -> (i32, i32) {
    %c0_i32 = arith.constant 0 : i32
    %c0_i32_0 = arith.constant 0 : i32
    %c0_i32_1 = arith.constant 0 : i32
    return %c0_i32, %c0_i32_0 : i32, i32
  }
  func.func @transform_7(%arg0: i32, %arg1: i32) -> (i32, i32) {
    %c0_i32 = arith.constant 0 : i32
    %c0_i32_0 = arith.constant 0 : i32
    %c0_i32_1 = arith.constant 0 : i32
    return %c0_i32, %c0_i32_0 : i32, i32
  }
  func.func @transform_8(%arg0: i32, %arg1: i32) -> (i32, i32) {
    %c0_i32 = arith.constant 0 : i32
    %c0_i32_0 = arith.constant 0 : i32
    %c0_i32_1 = arith.constant 0 : i32
    return %c0_i32, %c0_i32_0 : i32, i32
  }
  func.func @transform_9(%arg0: i32, %arg1: i32) -> (i32, i32) {
    %c0_i32 = arith.constant 0 : i32
    %c0_i32_0 = arith.constant 0 : i32
    %c0_i32_1 = arith.constant 0 : i32
    return %c0_i32, %c0_i32_0 : i32, i32
  }
  func.func @transform_10(%arg0: i32, %arg1: i32) -> (i32, i32) {
    %c0_i32 = arith.constant 0 : i32
    %c0_i32_0 = arith.constant 0 : i32
    %c0_i32_1 = arith.constant 0 : i32
    return %c0_i32, %c0_i32_0 : i32, i32
  }
  func.func @transform_11(%arg0: i32, %arg1: i32) -> (i32, i32) {
    %c0_i32 = arith.constant 0 : i32
    %c0_i32_0 = arith.constant 0 : i32
    return %arg0, %c0_i32 : i32, i32
  }
}

</mosaic_0001>

<bundles_post_ra>
// kernel: critic_forward.1
= control target key start
LH: loop header
LB: loop body
LE: loop exit
PB: predicated region body
PF: predicated region fallthrough
CT: control target
= control target key end

     0   :  { %vm1191_vm0 = vmmov 0   ;;  %vm431_vm1 = vcmask 130112   ;;  %vm438_vm2 = vcmask 195712   ;;  %vm445_vm3 = vcmask 261312   ;;  %s1778_s0 = inlined_call_operand.vmem [shape: f32[2,128,256], index: 0, kind: input, shape index: {}]   ;;  %s1779_s2 = inlined_call_operand.vmem [shape: f32[128,50], index: 2, kind: input, shape index: {}]   ;;  %s1780_s5 = inlined_call_operand.vmem [shape: f32[8,64], index: 5, kind: input, shape index: {}]   ;;  %s1781_s1 = inlined_call_operand.vmem [shape: f32[2,8], index: 1, kind: input, shape index: {}]   ;;  %s1782_s4 = inlined_call_operand.vmem [shape: f32[50,64], index: 4, kind: input, shape index: {}]   ;;  %s1783_s3 = inlined_call_operand.vmem [shape: f32[1,50], index: 3, kind: input, shape index: {}]   ;;  %s1784_s7 = inlined_call_operand.vmem [shape: f32[64,64], index: 7, kind: input, shape index: {}]   ;;  %s1785_s9 = inlined_call_operand.vmem [shape: f32[64,128], index: 9, kind: input, shape index: {}]   ;;  %s1786_s6 = inlined_call_operand.vmem [shape: f32[1,64], index: 6, kind: input, shape index: {}]   ;;  %s1787_s8 = inlined_call_operand.vmem [shape: f32[1,64], index: 8, kind: input, shape index: {}]   ;;  %s1788_s10 = inlined_call_operand.vmem [shape: f32[1,128], index: 10, kind: input, shape index: {}]   ;;  %s1789_s11 = inlined_call_operand.vmem [shape: f32[2,128], index: 11, kind: output, shape index: {}]  }
   0x1   :  { %v106_v0 = vld [vmem:[%s1778_s0 + $0x100] sm:$0xff]  ;;  %v107_v1 = vld [vmem:[%s1778_s0 + $0x108] sm:$0xff]  ;;  %v108_v5 = vld [vmem:[%s1778_s0 + $0x110] sm:$0xff]  ;;  %vm452_vm4 = vcmask 326912   ;;  %vm459_vm5 = vcmask 392512   ;;  %vm466_vm6 = vcmask 458112  }
   0x2   :  { %v74_v2 = vld [vmem:[%s1778_s0] sm:$0xff]  ;;  %v218_v3 = vmax.f32 %v106_v0, %v107_v1  ;;  %v75_v4 = vld [vmem:[%s1778_s0 + $0x8] sm:$0xff]  ;;  %v109_v6 = vld [vmem:[%s1778_s0 + $0x118] sm:$0xff]  ;;  %vm473_vm7 = vcmask 523712   ;;  %vm480_vm8 = vcmask 589312   ;;  %vm487_vm9 = vcmask 654912  }
   0x3   :  { %v202_v7 = vmax.f32 %v74_v2, %v75_v4  ;;  %v76_v8 = vld [vmem:[%s1778_s0 + $0x10] sm:$0xff]  ;;  %v77_v9 = vld [vmem:[%s1778_s0 + $0x18] sm:$0xff]  ;;  %v219_v10 = vmax.f32 %v108_v5, %v109_v6  ;;  %v110_v12 = vld [vmem:[%s1778_s0 + $0x120] sm:$0xff]  ;;  %vm494_vm10 = vcmask 720512   ;;  %vm501_vm11 = vcmask 786112  }
   0x4   :  { %333 = vmax.xlane.f32.xlu1 %v218_v3  ;;  %v203_v11 = vmax.f32 %v76_v8, %v77_v9  ;;  %v111_v13 = vld [vmem:[%s1778_s0 + $0x128] sm:$0xff]  ;;  %v78_v14 = vld [vmem:[%s1778_s0 + $0x20] sm:$0xff]  ;;  %v112_v18 = vld [vmem:[%s1778_s0 + $0x130] sm:$0xff]  ;;  %vm508_vm12 = vcmask 851712   ;;  %vm515_vm13 = vcmask 917312   ;;  %vm522_vm14 = vcmask 982912  }
   0x5   :  { %301 = vmax.xlane.f32.xlu0 %v202_v7  ;;  %v79_v15 = vld [vmem:[%s1778_s0 + $0x28] sm:$0xff]  ;;  %v220_v16 = vmax.f32 %v110_v12, %v111_v13  ;;  %v113_v19 = vld [vmem:[%s1778_s0 + $0x138] sm:$0xff]  ;;  %v80_v20 = vld [vmem:[%s1778_s0 + $0x30] sm:$0xff]  ;;  %v1190_v12 = vmov 0.0   ;;  %vm529_vm15 = vcmask 1048512  }
   0x6   :  { %v204_v17 = vmax.f32 %v78_v14, %v79_v15  ;;  %v81_v21 = vld [vmem:[%s1778_s0 + $0x38] sm:$0xff]  ;;  %v221_v22 = vmax.f32 %v112_v18, %v113_v19  ;;  %v114_v24 = vld [vmem:[%s1778_s0 + $0x140] sm:$0xff]  ;;  %v115_v25 = vld [vmem:[%s1778_s0 + $0x148] sm:$0xff]  ;;  %1091 = vmatprep.subr.mxu0 %v1190_v12  ;;  %1126 = vmatprep.subr.mxu1 %v1190_v12 }
   0x7   :  { %v205_v23 = vmax.f32 %v80_v20, %v81_v21  ;;  %v82_v26 = vld [vmem:[%s1778_s0 + $0x40] sm:$0xff]  ;;  %v83_v27 = vld [vmem:[%s1778_s0 + $0x48] sm:$0xff]  ;;  %v222_v28 = vmax.f32 %v114_v24, %v115_v25  ;;  %v116_v30 = vld [vmem:[%s1778_s0 + $0x150] sm:$0xff]  ;;  %1123 = vmatprep.mubr.msk.f32.mxu0 %vm1191_vm0, %v1190_v12  ;;  %1128 = vmatprep.mubr.msk.f32.mxu1 %vm1191_vm0, %v1190_v12 }
   0x8   :  { %335 = vmax.xlane.f32.xlu1 %v219_v10  ;;  %v206_v29 = vmax.f32 %v82_v26, %v83_v27  ;;  %v117_v31 = vld [vmem:[%s1778_s0 + $0x158] sm:$0xff]  ;;  %v84_v32 = vld [vmem:[%s1778_s0 + $0x50] sm:$0xff]  ;;  %v118_v36 = vld [vmem:[%s1778_s0 + $0x160] sm:$0xff] }
   0x9   :  { %303 = vmax.xlane.f32.xlu0 %v203_v11  ;;  %v85_v33 = vld [vmem:[%s1778_s0 + $0x58] sm:$0xff]  ;;  %v223_v34 = vmax.f32 %v116_v30, %v117_v31  ;;  %v119_v37 = vld [vmem:[%s1778_s0 + $0x168] sm:$0xff]  ;;  %v86_v38 = vld [vmem:[%s1778_s0 + $0x60] sm:$0xff] }
   0xa   :  { %v207_v35 = vmax.f32 %v84_v32, %v85_v33  ;;  %v87_v39 = vld [vmem:[%s1778_s0 + $0x68] sm:$0xff]  ;;  %v224_v40 = vmax.f32 %v118_v36, %v119_v37  ;;  %v120_v42 = vld [vmem:[%s1778_s0 + $0x170] sm:$0xff]  ;;  %v121_v43 = vld [vmem:[%s1778_s0 + $0x178] sm:$0xff] }
   0xb   :  { %v208_v41 = vmax.f32 %v86_v38, %v87_v39  ;;  %v88_v44 = vld [vmem:[%s1778_s0 + $0x70] sm:$0xff]  ;;  %v89_v45 = vld [vmem:[%s1778_s0 + $0x78] sm:$0xff]  ;;  %v225_v46 = vmax.f32 %v120_v42, %v121_v43  ;;  %v122_v48 = vld [vmem:[%s1778_s0 + $0x180] sm:$0xff] }
   0xc   :  { %337 = vmax.xlane.f32.xlu1 %v220_v16  ;;  %v209_v47 = vmax.f32 %v88_v44, %v89_v45  ;;  %v123_v49 = vld [vmem:[%s1778_s0 + $0x188] sm:$0xff]  ;;  %v90_v50 = vld [vmem:[%s1778_s0 + $0x80] sm:$0xff]  ;;  %v124_v54 = vld [vmem:[%s1778_s0 + $0x190] sm:$0xff] }
   0xd   :  { %305 = vmax.xlane.f32.xlu0 %v204_v17  ;;  %v91_v51 = vld [vmem:[%s1778_s0 + $0x88] sm:$0xff]  ;;  %v226_v52 = vmax.f32 %v122_v48, %v123_v49  ;;  %v125_v55 = vld [vmem:[%s1778_s0 + $0x198] sm:$0xff]  ;;  %v92_v56 = vld [vmem:[%s1778_s0 + $0x90] sm:$0xff] }
   0xe   :  { %v210_v53 = vmax.f32 %v90_v50, %v91_v51  ;;  %v93_v57 = vld [vmem:[%s1778_s0 + $0x98] sm:$0xff]  ;;  %v227_v58 = vmax.f32 %v124_v54, %v125_v55  ;;  %v126_v60 = vld [vmem:[%s1778_s0 + $0x1a0] sm:$0xff]  ;;  %v127_v61 = vld [vmem:[%s1778_s0 + $0x1a8] sm:$0xff] }
   0xf   :  { %v211_v59 = vmax.f32 %v92_v56, %v93_v57  ;;  %v94_v62 = vld [vmem:[%s1778_s0 + $0xa0] sm:$0xff]  ;;  %v95_v63 = vld [vmem:[%s1778_s0 + $0xa8] sm:$0xff]  ;;  %v228_v0 = vmax.f32 %v126_v60, %v127_v61  ;;  %v128_v2 = vld [vmem:[%s1778_s0 + $0x1b0] sm:$0xff] }
  0x10   :  { %339 = vmax.xlane.f32.xlu1 %v221_v22  ;;  %v212_v1 = vmax.f32 %v94_v62, %v95_v63  ;;  %v129_v3 = vld [vmem:[%s1778_s0 + $0x1b8] sm:$0xff]  ;;  %v96_v4 = vld [vmem:[%s1778_s0 + $0xb0] sm:$0xff]  ;;  %v130_v8 = vld [vmem:[%s1778_s0 + $0x1c0] sm:$0xff] }
  0x11   :  { %307 = vmax.xlane.f32.xlu0 %v205_v23  ;;  %v97_v5 = vld [vmem:[%s1778_s0 + $0xb8] sm:$0xff]  ;;  %v229_v6 = vmax.f32 %v128_v2, %v129_v3  ;;  %v131_v9 = vld [vmem:[%s1778_s0 + $0x1c8] sm:$0xff]  ;;  %v98_v10 = vld [vmem:[%s1778_s0 + $0xc0] sm:$0xff] }
  0x12   :  { %v213_v7 = vmax.f32 %v96_v4, %v97_v5  ;;  %v99_v11 = vld [vmem:[%s1778_s0 + $0xc8] sm:$0xff]  ;;  %v380_v13 = vld [vmem:[%s1779_s2 + $0x78] sm:$0xff]  ;;  %v230_v14 = vmax.f32 %v130_v8, %v131_v9  ;;  %v132_v16 = vld [vmem:[%s1778_s0 + $0x1d0] sm:$0xff] }
  0x13   :  { %1092 = vmatpush3.msra.mxu0 %v380_v13  ;;  %v214_v15 = vmax.f32 %v98_v10, %v99_v11  ;;  %v133_v17 = vld [vmem:[%s1778_s0 + $0x1d8] sm:$0xff]  ;;  %v379_v18 = vld [vmem:[%s1779_s2 + $0x70] sm:$0xff]  ;;  %v378_v21 = vld [vmem:[%s1779_s2 + $0x68] sm:$0xff] }
  0x14   :  { %341 = vmax.xlane.f32.xlu1 %v222_v28  ;;  %1093 = vmatprep.subr.mxu0 %v1190_v12  ;;  %v100_v19 = vld [vmem:[%s1778_s0 + $0xd0] sm:$0xff]  ;;  %v101_v20 = vld [vmem:[%s1778_s0 + $0xd8] sm:$0xff]  ;;  %v231_v22 = vmax.f32 %v132_v16, %v133_v17  ;;  %v134_v24 = vld [vmem:[%s1778_s0 + $0x1e0] sm:$0xff] }
  0x15   :  { %309 = vmax.xlane.f32.xlu0 %v206_v29  ;;  %1094 = vmatpush3.msra.mxu0 %v379_v18  ;;  %v215_v23 = vmax.f32 %v100_v19, %v101_v20  ;;  %v135_v25 = vld [vmem:[%s1778_s0 + $0x1e8] sm:$0xff]  ;;  %v377_v26 = vld [vmem:[%s1779_s2 + $0x60] sm:$0xff]  ;;  %v376_v29 = vld [vmem:[%s1779_s2 + $0x58] sm:$0xff] }
  0x16   :  { %1095 = vmatprep.subr.mxu0 %v1190_v12  ;;  %v102_v27 = vld [vmem:[%s1778_s0 + $0xe0] sm:$0xff]  ;;  %v103_v28 = vld [vmem:[%s1778_s0 + $0xe8] sm:$0xff]  ;;  %v232_v30 = vmax.f32 %v134_v24, %v135_v25  ;;  %v136_v32 = vld [vmem:[%s1778_s0 + $0x1f0] sm:$0xff] }
  0x17   :  { %1096 = vmatpush3.msra.mxu0 %v378_v21  ;;  %v216_v31 = vmax.f32 %v102_v27, %v103_v28  ;;  %v137_v33 = vld [vmem:[%s1778_s0 + $0x1f8] sm:$0xff]  ;;  %v374_v37 = vld [vmem:[%s1779_s2 + $0x48] sm:$0xff]  ;;  %v371_v42 = vld [vmem:[%s1779_s2 + $0x30] sm:$0xff] }
  0x18   :  { %343 = vmax.xlane.f32.xlu1 %v223_v34  ;;  %1097 = vmatprep.subr.mxu0 %v1190_v12  ;;  %v375_v34 = vld [vmem:[%s1779_s2 + $0x50] sm:$0xff]  ;;  %v105_v36 = vld [vmem:[%s1778_s0 + $0xf8] sm:$0xff]  ;;  %v233_v38 = vmax.f32 %v136_v32, %v137_v33  ;;  %v370_v43 = vld [vmem:[%s1779_s2 + $0x28] sm:$0xff] }
  0x19   :  { %311 = vmax.xlane.f32.xlu0 %v207_v35  ;;  %1098 = vmatpush3.msra.mxu0 %v377_v26  ;;  %v104_v35 = vld [vmem:[%s1778_s0 + $0xf0] sm:$0xff]  ;;  %v369_v44 = vld [vmem:[%s1779_s2 + $0x20] sm:$0xff]  ;;  %v368_v45 = vld [vmem:[%s1779_s2 + $0x18] sm:$0xff] }
  0x1a   :  { %1099 = vmatprep.subr.mxu0 %v1190_v12  ;;  %v217_v39 = vmax.f32 %v104_v35, %v105_v36  ;;  %v365_v48 = vld [vmem:[%s1779_s2] sm:$0xff] }
  0x1b   :  { %1100 = vmatpush3.msra.mxu0 %v376_v29 }
  0x1c   :  { %345 = vmax.xlane.f32.xlu1 %v224_v40  ;;  %1101 = vmatprep.subr.mxu0 %v1190_v12  ;;  %v373_v40 = vld [vmem:[%s1779_s2 + $0x40] sm:$0xff] }
  0x1d   :  { %313 = vmax.xlane.f32.xlu0 %v208_v41  ;;  %1102 = vmatpush3.msra.mxu0 %v375_v34  ;;  %v372_v41 = vld [vmem:[%s1779_s2 + $0x38] sm:$0xff] }
  0x1e   :  { %1103 = vmatprep.subr.mxu0 %v1190_v12 }
  0x1f   :  { %1104 = vmatpush3.msra.mxu0 %v374_v37 }
  0x20   :  { %347 = vmax.xlane.f32.xlu1 %v225_v46  ;;  %1105 = vmatprep.subr.mxu0 %v1190_v12  ;;  %v367_v46 = vld [vmem:[%s1779_s2 + $0x10] sm:$0xff] }
  0x21   :  { %315 = vmax.xlane.f32.xlu0 %v209_v47  ;;  %1106 = vmatpush3.msra.mxu0 %v373_v40  ;;  %v366_v47 = vld [vmem:[%s1779_s2 + $0x8] sm:$0xff] }
  0x22   :  { %1107 = vmatprep.subr.mxu0 %v1190_v12 }
  0x23   :  { %1108 = vmatpush3.msra.mxu0 %v372_v41 }
  0x24   :  { %349 = vmax.xlane.f32.xlu1 %v226_v52  ;;  %1109 = vmatprep.subr.mxu0 %v1190_v12 }
  0x25   :  { %317 = vmax.xlane.f32.xlu0 %v210_v53  ;;  %1110 = vmatpush3.msra.mxu0 %v371_v42 }
  0x26   :  { %1111 = vmatprep.subr.mxu0 %v1190_v12 }
  0x27   :  { %1112 = vmatpush3.msra.mxu0 %v370_v43 }
  0x28   :  { %351 = vmax.xlane.f32.xlu1 %v227_v58  ;;  %1113 = vmatprep.subr.mxu0 %v1190_v12 }
  0x29   :  { %319 = vmax.xlane.f32.xlu0 %v211_v59  ;;  %1114 = vmatpush3.msra.mxu0 %v369_v44 }
  0x2a   :  { %1115 = vmatprep.subr.mxu0 %v1190_v12 }
  0x2b   :  { %1116 = vmatpush3.msra.mxu0 %v368_v45 }
  0x2c   :  { %353 = vmax.xlane.f32.xlu1 %v228_v0  ;;  %1117 = vmatprep.subr.mxu0 %v1190_v12  ;;  %v420_v0 = vlaneseq }
  0x2d   :  { %321 = vmax.xlane.f32.xlu0 %v212_v1  ;;  %1118 = vmatpush3.msra.mxu0 %v367_v46 }
  0x2e   :  { %1119 = vmatprep.subr.mxu0 %v1190_v12  ;;  %v421_v3 = vand.u32 127, %v420_v0  ;;  %v1550_v5 = vshrl.u32 %v420_v0, 7 }
  0x2f   :  { %1120 = vmatpush3.msra.mxu0 %v366_v47 }
  0x30   :  { %355 = vmax.xlane.f32.xlu1 %v229_v6  ;;  %1121 = vmatprep.subr.mxu0 %v1190_v12  ;;  %v426_v6 = vadd.s32 4294967288, %v421_v3  ;;  %v440_v8 = vadd.s32 4294967272, %v421_v3  ;;  %v447_v10 = vadd.s32 4294967264, %v421_v3  ;;  %v424_v13 = vsub.s32 %v421_v3, %v1550_v5 }
  0x31   :  { %323 = vmax.xlane.f32.xlu0 %v213_v7  ;;  %1122 = vmatpush3.msra.mxu0 %v365_v48  ;;  %v433_v7 = vadd.s32 4294967280, %v421_v3  ;;  %v461_v17 = vadd.s32 4294967248, %v421_v3  ;;  %v468_v19 = vadd.s32 4294967240, %v421_v3  ;;  %v475_v20 = vadd.s32 4294967232, %v421_v3 }
  0x32   :  { %1167 = vmatprep.subr.mxu0 %v1190_v12  ;;  %v443_v18 = vsub.s32 %v440_v8, %v1550_v5  ;;  %v489_v24 = vadd.s32 4294967216, %v421_v3  ;;  %v496_v27 = vadd.s32 4294967208, %v421_v3  ;;  %v503_v28 = vadd.s32 4294967200, %v421_v3 }
  0x33   :  { %v436_v16 = vsub.s32 %v433_v7, %v1550_v5  ;;  %v464_v29 = vsub.s32 %v461_v17, %v1550_v5  ;;  %v1569_v32 = vsub.s32 %v475_v20, %v1550_v5  ;;  %v517_v34 = vadd.s32 4294967184, %v421_v3 }
  0x34   :  { %357 = vmax.xlane.f32.xlu1 %v230_v14  ;;  %v454_v14 = vadd.s32 4294967256, %v421_v3  ;;  %v1578_v37 = vsub.s32 %v489_v24, %v1550_v5  ;;  %v1585_v42 = vsub.s32 %v496_v27, %v1550_v5  ;;  %v1588_v43 = vsub.s32 %v503_v28, %v1550_v5 }
  0x35   :  { %325 = vmax.xlane.f32.xlu0 %v214_v15  ;;  %v429_v15 = vsub.s32 %v426_v6, %v1550_v5  ;;  %v1600_v0 = vsub.s32 %v517_v34, %v1550_v5 }
  0x36   :  { %v457_v26 = vsub.s32 %v454_v14, %v1550_v5 }
  0x38   :  { %359 = vmax.xlane.f32.xlu1 %v231_v22  ;;  %v450_v22 = vsub.s32 %v447_v10, %v1550_v5 }
  0x39   :  { %327 = vmax.xlane.f32.xlu0 %v215_v23  ;;  %v482_v23 = vadd.s32 4294967224, %v421_v3 }
  0x3b   :  { %v1575_v36 = vsub.s32 %v482_v23, %v1550_v5 }
  0x3c   :  { %361 = vmax.xlane.f32.xlu1 %v232_v30  ;;  %v510_v30 = vadd.s32 4294967192, %v421_v3 }
  0x3d   :  { %329 = vmax.xlane.f32.xlu0 %v216_v31  ;;  %v471_v31 = vsub.s32 %v468_v19, %v1550_v5 }
  0x3e   :  { %v1594_v47 = vsub.s32 %v510_v30, %v1550_v5 }
  0x40   :  { %363 = vmax.xlane.f32.xlu1 %v233_v38 }
  0x41   :  { %331 = vmax.xlane.f32.xlu0 %v217_v39  ;;  %v524_v39 = vadd.s32 4294967176, %v421_v3 }
  0x43   :  { %v527_v6 = vsub.s32 %v524_v39, %v1550_v5 }
  0x8d   :  { %v1514_v49 = vpop.xlane.xlu1 %333 }
  0x8e   :  { %v1516_v50 = vpop.xlane.xlu0 %301  ;;  %v534_v44 = vrot.slane %v1514_v49, %v424_v13 }
  0x8f   :  { %v425_v48 = vrot.slane %v1516_v50, %v424_v13 }
  0x91   :  { %v1518_v51 = vpop.xlane.xlu1 %335 }
  0x92   :  { %v1520_v52 = vpop.xlane.xlu0 %303  ;;  %v538_v35 = vrot.slane %v1518_v51, %v429_v15 }
  0x93   :  { %v430_v40 = vrot.slane %v1520_v52, %v429_v15 }
  0x94   :  { %v539_v49 = vsel %vm431_vm1, %v538_v35, %v534_v44 }
  0x95   :  { %v1522_v53 = vpop.xlane.xlu1 %337  ;;  %v432_v50 = vsel %vm431_vm1, %v430_v40, %v425_v48  ;;  %vm610_vm1 = vcmask 1041409  }
  0x96   :  { %v1524_v54 = vpop.xlane.xlu0 %305  ;;  %v543_v41 = vrot.slane %v1522_v53, %v436_v16 }
  0x97   :  { %v437_v45 = vrot.slane %v1524_v54, %v436_v16 }
  0x99   :  { %v1526_v55 = vpop.xlane.xlu1 %339  ;;  %v439_v8 = vsel %vm438_vm2, %v437_v45, %v432_v50  ;;  %v686_v50 = vld [vmem:[%s1782_s4 + $0x10] sm:$0xff] }
  0x9a   :  { %v1528_v56 = vpop.xlane.xlu0 %307  ;;  %v548_v46 = vrot.slane %v1526_v55, %v443_v18 }
  0x9b   :  { %v444_v51 = vrot.slane %v1528_v56, %v443_v18  ;;  %v544_v56 = vsel %vm438_vm2, %v543_v41, %v539_v49  ;;  %v691_v49 = vld [vmem:[%s1781_s1] sm:$0x3]  ;;  %vm693_vm2 = vcmask 64512  }
  0x9c   :  { %v549_v10 = vsel %vm445_vm3, %v548_v46, %v544_v56  ;;  %v685_v56 = vld [vmem:[%s1782_s4 + $0x8] sm:$0xff] }
  0x9d   :  { %v1530_v57 = vpop.xlane.xlu1 %341  ;;  %v446_v13 = vsel %vm445_vm3, %v444_v51, %v439_v8  ;;  %vm771_vm3 = vcmask 1041408  }
  0x9e   :  { %v1532_v58 = vpop.xlane.xlu0 %309  ;;  %v553_v52 = vrot.slane %v1530_v57, %v450_v22 }
  0x9f   :  { %v451_v54 = vrot.slane %v1532_v58, %v450_v22 }
  0xa0   :  { %v554_v5 = vsel %vm452_vm4, %v553_v52, %v549_v10 }
  0xa1   :  { %v1534_v59 = vpop.xlane.xlu1 %343 }
  0xa2   :  { %v1536_v60 = vpop.xlane.xlu0 %311  ;;  %v558_v55 = vrot.slane %v1534_v59, %v457_v26 }
  0xa3   :  { %v458_v57 = vrot.slane %v1536_v60, %v457_v26 }
  0xa4   :  { %v559_v16 = vsel %vm459_vm5, %v558_v55, %v554_v5  ;;  %v689_v55 = vld [vmem:[%s1782_s4 + $0x28] sm:$0xff]  ;;  %v860_v5 = vld [vmem:[%s1784_s7 + $0x30] sm:$0xff] }
  0xa5   :  { %v1538_v61 = vpop.xlane.xlu1 %345 }
  0xa6   :  { %v1540_v62 = vpop.xlane.xlu0 %313  ;;  %v563_v7 = vrot.slane %v1538_v61, %v464_v29  ;;  %v453_v61 = vsel %vm452_vm4, %v451_v54, %v446_v13  ;;  %v690_v54 = vld [vmem:[%s1782_s4 + $0x30] sm:$0x3]  ;;  %vm767_vm4 = vcmask 408576  }
  0xa7   :  { %v465_v58 = vrot.slane %v1540_v62, %v464_v29  ;;  %v460_v18 = vsel %vm459_vm5, %v458_v57, %v453_v61  ;;  %v684_v57 = vld [vmem:[%s1782_s4] sm:$0xff] }
  0xa8   :  { %v564_v19 = vsel %vm466_vm6, %v563_v7, %v559_v16  ;;  %v1037_v7 = vld [vmem:[%s1783_s3] ss:$0 sm:$0xff]  ;;  %v857_v16 = vld [vmem:[%s1784_s7 + $0x18] sm:$0xff] }
  0xa9   :  { %v1542_v63 = vpop.xlane.xlu1 %347  ;;  %v467_v20 = vsel %vm466_vm6, %v465_v58, %v460_v18  ;;  %v951_v18 = vld [vmem:[%s1785_s9 + $0x38] sm:$0xff] }
  0xaa   :  { %v1544_v1 = vpop.xlane.xlu0 %315  ;;  %v568_v59 = vrot.slane %v1542_v63, %v471_v31 }
  0xab   :  { %v472_v14 = vrot.slane %v1544_v1, %v471_v31 }
  0xac   :  { %v569_v22 = vsel %vm473_vm7, %v568_v59, %v564_v19  ;;  %v861_v59 = vld [vmem:[%s1784_s7 + $0x38] sm:$0xff]  ;;  %v950_v19 = vld [vmem:[%s1785_s9 + $0x30] sm:$0xff] }
  0xad   :  { %v1546_v2 = vpop.xlane.xlu1 %349  ;;  %v474_v23 = vsel %vm473_vm7, %v472_v14, %v467_v20  ;;  %v859_v14 = vld [vmem:[%s1784_s7 + $0x28] sm:$0xff]  ;;  %v947_v20 = vld [vmem:[%s1785_s9 + $0x18] sm:$0xff] }
  0xae   :  { %v1548_v4 = vpop.xlane.xlu0 %317  ;;  %v573_v60 = vrot.slane %v1546_v2, %v1569_v32 }
  0xaf   :  { %v479_v17 = vrot.slane %v1548_v4, %v1569_v32 }
  0xb0   :  { %v574_v24 = vsel %vm480_vm8, %v573_v60, %v569_v22  ;;  %v858_v60 = vld [vmem:[%s1784_s7 + $0x20] sm:$0xff] }
  0xb1   :  { %v1552_v9 = vpop.xlane.xlu1 %351  ;;  %v481_v27 = vsel %vm480_vm8, %v479_v17, %v474_v23  ;;  %v856_v17 = vld [vmem:[%s1784_s7 + $0x10] sm:$0xff] }
  0xb2   :  { %v1554_v11 = vpop.xlane.xlu0 %319  ;;  %v578_v62 = vrot.slane %v1552_v9, %v1575_v36 }
  0xb3   :  { %v486_v1 = vrot.slane %v1554_v11, %v1575_v36 }
  0xb4   :  { %v579_v28 = vsel %vm487_vm9, %v578_v62, %v574_v24  ;;  %v855_v62 = vld [vmem:[%s1784_s7 + $0x8] sm:$0xff] }
  0xb5   :  { %v1560_v21 = vpop.xlane.xlu1 %353  ;;  %v488_v31 = vsel %vm487_vm9, %v486_v1, %v481_v27  ;;  %v949_v1 = vld [vmem:[%s1785_s9 + $0x28] sm:$0xff]  ;;  %v944_v27 = vld [vmem:[%s1785_s9] sm:$0xff] }
  0xb6   :  { %v1563_v25 = vpop.xlane.xlu0 %321  ;;  %v583_v2 = vrot.slane %v1560_v21, %v1578_v37 }
  0xb7   :  { %v493_v4 = vrot.slane %v1563_v25, %v1578_v37 }
  0xb8   :  { %v584_v32 = vsel %vm494_vm10, %v583_v2, %v579_v28  ;;  %v948_v2 = vld [vmem:[%s1785_s9 + $0x20] sm:$0xff] }
  0xb9   :  { %v1571_v33 = vpop.xlane.xlu1 %355  ;;  %v495_v35 = vsel %vm494_vm10, %v493_v4, %v488_v31  ;;  %v1041_v4 = vld [vmem:[%s1786_s6] ss:$0 sm:$0xff] }
  0xba   :  { %v1580_v38 = vpop.xlane.xlu0 %323  ;;  %v588_v9 = vrot.slane %v1571_v33, %v1585_v42  ;;  %v1042_v28 = vld [vmem:[%s1787_s8] ss:$0 sm:$0xff] }
  0xbb   :  { %v500_v11 = vrot.slane %v1580_v38, %v1585_v42 }
  0xbc   :  { %v589_v36 = vsel %vm501_vm11, %v588_v9, %v584_v32  ;;  %v1044_v32 = vld [vmem:[%s1788_s10] ss:$0 sm:$0xff] }
  0xbd   :  { %v358_v53 = vpop.xlane.xlu1 %357  ;;  %v502_v38 = vsel %vm501_vm11, %v500_v11, %v495_v35 }
  0xbe   :  { %v326_v3 = vpop.xlane.xlu0 %325  ;;  %v593_v26 = vrot.slane %v358_v53, %v1588_v43 }
  0xbf   :  { %v507_v29 = vrot.slane %v326_v3, %v1588_v43  ;;  %v688_v3 = vld [vmem:[%s1782_s4 + $0x20] sm:$0xff] }
  0xc0   :  { %v594_v39 = vsel %vm508_vm12, %v593_v26, %v589_v36  ;;  %v946_v26 = vld [vmem:[%s1785_s9 + $0x10] sm:$0xff] }
  0xc1   :  { %v360_v15 = vpop.xlane.xlu1 %359  ;;  %v509_v41 = vsel %vm508_vm12, %v507_v29, %v502_v38 }
  0xc2   :  { %v328_v63 = vpop.xlane.xlu0 %327  ;;  %v598_v25 = vrot.slane %v360_v15, %v1594_v47 }
  0xc3   :  { %v514_v33 = vrot.slane %v328_v63, %v1594_v47  ;;  %v854_v63 = vld [vmem:[%s1784_s7] sm:$0xff] }
  0xc4   :  { %v599_v42 = vsel %vm515_vm13, %v598_v25, %v594_v39 }
  0xc5   :  { %v362_v21 = vpop.xlane.xlu1 %361  ;;  %v516_v45 = vsel %vm515_vm13, %v514_v33, %v509_v41 }
  0xc6   :  { %v330_v30 = vpop.xlane.xlu0 %329  ;;  %v603_v34 = vrot.slane %v362_v21, %v1600_v0  ;;  %v945_v21 = vld [vmem:[%s1785_s9 + $0x8] sm:$0xff] }
  0xc7   :  { %v521_v37 = vrot.slane %v330_v30, %v1600_v0  ;;  %v692_v0 = vld [vmem:[%s1780_s5] sm:$0xff] }
  0xc8   :  { %v604_v46 = vsel %vm522_vm14, %v603_v34, %v599_v42  ;;  %1127 = vmatpush3.msra.mxu1 %v692_v0 }
  0xc9   :  { %v364_v40 = vpop.xlane.xlu1 %363  ;;  %v523_v48 = vsel %vm522_vm14, %v521_v37, %v516_v45  ;;  %1129 = vmatmul.mubr.msk.f32.vlgmr.msra.gmra.mxu1 %vm693_vm2, %v691_v49  ;;  %1131 = vmatprep.subr.mxu1 %v1190_v12 }
  0xca   :  { %v608_v43 = vrot.slane %v364_v40, %v527_v6  ;;  %v332_v44 = vpop.xlane.xlu0 %331  ;;  %1145 = vmatprep.mubr.msk.f32.mxu1 %vm1191_vm0, %v1190_v12  ;;  %1132 = vmatpush3.msk.msra.mxu1 %vm771_vm3, %v690_v54 }
  0xcb   :  { %v528_v47 = vrot.slane %v332_v44, %v527_v6  ;;  %1133 = vmatprep.subr.mxu1 %v1190_v12  ;;  %v687_v6 = vld [vmem:[%s1782_s4 + $0x18] sm:$0xff] }
  0xcc   :  { %v609_v51 = vsel %vm529_vm15, %v608_v43, %v604_v46  ;;  %1134 = vmatpush3.msra.mxu1 %v689_v55 }
  0xcd   :  { %v530_v52 = vsel %vm529_vm15, %v528_v47, %v523_v48  ;;  %1135 = vmatprep.subr.mxu1 %v1190_v12 }
  0xce   :  { %v611_v53 = vsel %vm610_vm1, %v609_v51, %v530_v52  ;;  %1136 = vmatpush3.msra.mxu1 %v688_v3 }
  0xcf   :  { %1124 = vmatmul.mubr.f32.vlgmr.msra.gmra.mxu0 %v611_v53  ;;  %1137 = vmatprep.subr.mxu1 %v1190_v12 }
  0xd0   :  { %1183 = vmatprep.mubr.msk.f32.mxu0 %vm1191_vm0, %v1190_v12  ;;  %1138 = vmatpush3.msra.mxu1 %v687_v6 }
  0xd1   :  { %1139 = vmatprep.subr.mxu1 %v1190_v12  ;;  %1168 = vmatpush3.msra.mxu0 %v951_v18 }
  0xd2   :  { %1140 = vmatpush3.msra.mxu1 %v686_v50  ;;  %1169 = vmatprep.subr.mxu0 %v1190_v12 }
  0xd3   :  { %1141 = vmatprep.subr.mxu1 %v1190_v12  ;;  %1170 = vmatpush3.msra.mxu0 %v950_v19 }
  0xd4   :  { %1142 = vmatpush3.msra.mxu1 %v685_v56  ;;  %1171 = vmatprep.subr.mxu0 %v1190_v12 }
  0xd5   :  { %1143 = vmatprep.subr.mxu1 %v1190_v12  ;;  %1172 = vmatpush3.msra.mxu0 %v949_v1 }
  0xd6   :  { %1144 = vmatpush3.msra.mxu1 %v684_v57  ;;  %1173 = vmatprep.subr.mxu0 %v1190_v12 }
  0xd7   :  { %1148 = vmatprep.subr.mxu1 %v1190_v12  ;;  %1174 = vmatpush3.msra.mxu0 %v948_v2 }
  0xd8   :  { %1175 = vmatprep.subr.mxu0 %v1190_v12 }
  0xd9   :  { %1176 = vmatpush3.msra.mxu0 %v947_v20 }
  0xda   :  { %1177 = vmatprep.subr.mxu0 %v1190_v12 }
  0xdb   :  { %1178 = vmatpush3.msra.mxu0 %v946_v26 }
  0xdc   :  { %1179 = vmatprep.subr.mxu0 %v1190_v12 }
  0xdd   :  { %1180 = vmatpush3.msra.mxu0 %v945_v21 }
  0xde   :  { %1181 = vmatprep.subr.mxu0 %v1190_v12 }
  0xdf   :  { %1182 = vmatpush3.msra.mxu0 %v944_v27 }
 0x189   :  { %v763_v15 = vpop.f32.mrf.mxu1 }
 0x18b   :  { %v1130_v61 = vpop.f32.mrf.mxu1 }
 0x18f   :  { %v679_v8 = vpop.f32.mrf.mxu0 }
 0x190   :  { %v680_v10 = vadd.f32 %v1037_v7, %v679_v8 }
 0x191   :  { %v1125_v58 = vpop.f32.mrf.mxu0 }
 0x192   :  { %1188 = vtanh.f32 %v680_v10 }
 0x19f   :  { %v1189_v13 = vpop.eup %1188 }
 0x1a0   :  { %1146 = vmatmul.mubr.msk.f32.vlgmr.msra.gmra.mxu1 %vm767_vm4, %v1189_v13 }
 0x1a1   :  { %1149 = vmatpush3.msra.mxu1 %v861_v59  ;;  %1164 = vmatprep.mubr.msk.f32.mxu1 %vm1191_vm0, %v1190_v12  ;;  %vm869_vm0 = vcmask 523264  }
 0x1a2   :  { %1150 = vmatprep.subr.mxu1 %v1190_v12 }
 0x1a3   :  { %1151 = vmatpush3.msra.mxu1 %v860_v5 }
 0x1a4   :  { %1152 = vmatprep.subr.mxu1 %v1190_v12 }
 0x1a5   :  { %1153 = vmatpush3.msra.mxu1 %v859_v14 }
 0x1a6   :  { %1154 = vmatprep.subr.mxu1 %v1190_v12 }
 0x1a7   :  { %1155 = vmatpush3.msra.mxu1 %v858_v60 }
 0x1a8   :  { %1156 = vmatprep.subr.mxu1 %v1190_v12 }
 0x1a9   :  { %1157 = vmatpush3.msra.mxu1 %v857_v16 }
 0x1aa   :  { %1158 = vmatprep.subr.mxu1 %v1190_v12 }
 0x1ab   :  { %1159 = vmatpush3.msra.mxu1 %v856_v17 }
 0x1ac   :  { %1160 = vmatprep.subr.mxu1 %v1190_v12 }
 0x1ad   :  { %1161 = vmatpush3.msra.mxu1 %v855_v62 }
 0x1ae   :  { %1162 = vmatprep.subr.mxu1 %v1190_v12 }
 0x1af   :  { %1163 = vmatpush3.msra.mxu1 %v854_v63 }
 0x260   :  { %v841_v22 = vpop.f32.mrf.mxu1 }
 0x261   :  { %v842_v9 = vadd.f32 %v841_v22, %v763_v15 }
 0x262   :  { %v1147_v23 = vpop.f32.mrf.mxu1 }
 0x263   :  { %v852_v24 = vadd.f32 %v1041_v4, %v842_v9 }
 0x265   :  { %v853_v11 = vmax.f32 %v852_v24, 0.0 }
 0x267   :  { %1165 = vmatmul.mubr.msk.f32.vlgmr.msra.gmra.mxu1 %vm869_vm0, %v853_v11 }
 0x327   :  { %v939_v29 = vpop.f32.mrf.mxu1 }
 0x328   :  { %v940_v25 = vadd.f32 %v1042_v28, %v939_v29 }
 0x329   :  { %v1166_v30 = vpop.f32.mrf.mxu1 }
 0x32a   :  { %v943_v31 = vmax.f32 %v940_v25, 0.0 }
 0x32c   :  { %1184 = vmatmul.mubr.msk.f32.vlgmr.msra.gmra.mxu0 %vm869_vm0, %v943_v31 }
 0x3ec   :  { %v1028_v12 = vpop.f32.mrf.mxu0 }
 0x3ed   :  { %v1029_v33 = vadd.f32 %v1044_v32, %v1028_v12 }
 0x3ee   :  { %v1185_v34 = vpop.f32.mrf.mxu0 }
 0x3ef   :  { %1032 = vst [vmem:[%s1789_s11] sm:$0x3] %v1029_v33 }

</bundles_post_ra>
